<compile_context>
chip_gen: v7x
topology: tpu7x:2x2x1
jax: 0.10.0
libtpu: 0.0.40
codegen_flags: <defaults>
</compile_context>

<pallas_src>
import jax
import jax.numpy as jnp
from jax.experimental import pallas as pl
from jax.experimental.pallas import tpu as pltpu

LN_EPS = 1e-5  # torch.nn.LayerNorm default


def _make_prenorm_kernel(seg_sizes):
    """Build a kernel closed over the static per-tensor row counts."""
    offsets = []
    off = 0
    for s in seg_sizes:
        offsets.append(off)
        off += s

    def kernel(x_ref, p_ref, o_ref):
        # One load of the packed activation slab and one of the packed params.
        x = x_ref[...]                      # (R, dim) f32
        p = p_ref[...]                      # (8, dim): rows g1,b1,g2,b2,g3,b3,g4,b4

        # Row-wise LayerNorm statistics for the whole slab in one pass;
        # xc is bound once and reused for variance and normalization.
        mu = jnp.mean(x, axis=-1, keepdims=True)
        xc = x - mu
        var = jnp.mean(xc * xc, axis=-1, keepdims=True)
        # rsqrt lowers to the EUP transcendental slot -> overlaps with VPU work.
        xhat = xc * jax.lax.rsqrt(var + LN_EPS)

        # Per-tensor affine with static row slices (zero-cost ref views).
        for i, (o0, n) in enumerate(zip(offsets, seg_sizes)):
            g = p[2 * i:2 * i + 1, :]       # (1, dim)
            b = p[2 * i + 1:2 * i + 2, :]   # (1, dim)
            o_ref[o0:o0 + n, :] = xhat[o0:o0 + n, :] * g + b

    return kernel


def pre_norm_ahl(h_t, h_a, h_v, h_hyper, params, fn):
    """PreNormAHL.forward: fused 4x LayerNorm in one pallas_call, then fn(...)."""
    dim = h_t.shape[-1]
    tensors = (h_t, h_a, h_v, h_hyper)
    seg_sizes = tuple(int(jnp.size(t)) // dim for t in tensors)   # rows per tensor

    # Pack activations into one (R, dim) slab (1 input DMA instead of 4).
    x_packed = jnp.concatenate([t.reshape(-1, dim) for t in tensors], axis=0)

    # Pack the 8 affine vectors (accepting 1-D (dim,) weights like nn.LayerNorm)
    # into one (8, dim) array (1 DMA / 1 padded VMEM tile instead of 8).
    p_packed = jnp.stack([
        params["g1"].reshape(dim), params["b1"].reshape(dim),
        params["g2"].reshape(dim), params["b2"].reshape(dim),
        params["g3"].reshape(dim), params["b3"].reshape(dim),
        params["g4"].reshape(dim), params["b4"].reshape(dim),
    ], axis=0).astype(x_packed.dtype)

    vmem = pl.BlockSpec(memory_space=pltpu.MemorySpace.VMEM)
    y_packed = pl.pallas_call(
        _make_prenorm_kernel(seg_sizes),
        out_shape=jax.ShapeDtypeStruct(x_packed.shape, x_packed.dtype),
        in_specs=[vmem, vmem],
        out_specs=vmem,
    )(x_packed, p_packed)

    # Split the slab back into the four normalized tensors.
    outs = []
    off = 0
    for t, n in zip(tensors, seg_sizes):
        outs.append(y_packed[off:off + n].reshape(t.shape))
        off += n

    # TODO(synk): `fn` is an arbitrary injected nn.Module in the PyTorch spec;
    # it is applied here as a user-supplied JAX callable outside the kernel.
    return fn(*outs)


# ----------------------------- pure-JAX reference -----------------------------
def _ref_forward(h_t, h_a, h_v, h_hyper, params, fn):
    def ln(x, g, b):
        mu = x.mean(-1, keepdims=True)
        var = ((x - mu) ** 2).mean(-1, keepdims=True)
        return (x - mu) / jnp.sqrt(var + LN_EPS) * g + b

    return fn(ln(h_t, params["g1"], params["b1"]),
              ln(h_a, params["g2"], params["b2"]),
              ln(h_v, params["g3"], params["b3"]),
              ln(h_hyper, params["g4"], params["b4"]))


# ----------------------------- main -----------------------------
if __name__ == "__main__":
    DIM, BATCH, SEQ, SEQ_HYPER = 32, 2, 8, 4

    key = jax.random.PRNGKey(0)
    kt, ka, kv, kh, kg, kb = jax.random.split(key, 6)
    h_t = jax.random.normal(kt, (BATCH, SEQ, DIM), jnp.float32)
    h_a = jax.random.normal(ka, (BATCH, SEQ, DIM), jnp.float32)
    h_v = jax.random.normal(kv, (BATCH, SEQ, DIM), jnp.float32)
    h_hyper = jax.random.normal(kh, (BATCH, SEQ_HYPER, DIM), jnp.float32)

    # Learned LayerNorm affine params, 1-D (DIM,) just like nn.LayerNorm weights.
    gs = 1.0 + 0.1 * jax.random.normal(kg, (4, DIM), jnp.float32)
    bs = 0.1 * jax.random.normal(kb, (4, DIM), jnp.float32)
    params = {f"g{i + 1}": gs[i] for i in range(4)}
    params.update({f"b{i + 1}": bs[i] for i in range(4)})

    # Demo fn: identity over the four normalized tensors (fn is user-injected
    # in the PyTorch module; identity lets us validate the kernel directly).
    fn = lambda t, a, v, h: (t, a, v, h)

    outs = jax.block_until_ready(pre_norm_ahl(h_t, h_a, h_v, h_hyper, params, fn))
    refs = _ref_forward(h_t, h_a, h_v, h_hyper, params, fn)

    for o, r in zip(outs, refs):
        assert o.shape == r.shape
        assert jnp.allclose(o, r, atol=1e-5, rtol=1e-5), "mismatch vs reference"

    print("KERNEL_OK")
</pallas_src>

<mosaic_0001>
module attributes {stable_mosaic.version = 11 : i64} {
  func.func @kernel(%arg0: memref<56x32xf32, #tpu.memory_space<vmem>>, %arg1: memref<8x32xf32, #tpu.memory_space<vmem>>, %arg2: memref<56x32xf32, #tpu.memory_space<vmem>>) attributes {dimension_semantics = [], scalar_prefetch = 0 : i64, scratch_operands = 0 : i64, tpu.core_type = #tpu.core_type<tc>} {
    %c0 = arith.constant 0 : index
    %c0_0 = arith.constant 0 : index
    %0 = vector.load %arg0[%c0, %c0_0] : memref<56x32xf32, #tpu.memory_space<vmem>>, vector<56x32xf32>
    %c0_1 = arith.constant 0 : index
    %c0_2 = arith.constant 0 : index
    %1 = vector.load %arg1[%c0_1, %c0_2] : memref<8x32xf32, #tpu.memory_space<vmem>>, vector<8x32xf32>
    %cst = arith.constant dense<0.000000e+00> : vector<56xf32>
    %2 = vector.multi_reduction <add>, %0, %cst [1] : vector<56x32xf32> to vector<56xf32>
    %3 = vector.shape_cast %2 : vector<56xf32> to vector<56x1xf32>
    %cst_3 = arith.constant 3.200000e+01 : f32
    %4 = vector.broadcast %cst_3 : f32 to vector<56x1xf32>
    %5 = arith.divf %3, %4 : vector<56x1xf32>
    %6 = vector.broadcast %5 : vector<56x1xf32> to vector<56x32xf32>
    %7 = arith.subf %0, %6 : vector<56x32xf32>
    %8 = arith.mulf %7, %7 : vector<56x32xf32>
    %cst_4 = arith.constant dense<0.000000e+00> : vector<56xf32>
    %9 = vector.multi_reduction <add>, %8, %cst_4 [1] : vector<56x32xf32> to vector<56xf32>
    %10 = vector.shape_cast %9 : vector<56xf32> to vector<56x1xf32>
    %cst_5 = arith.constant 3.200000e+01 : f32
    %11 = vector.broadcast %cst_5 : f32 to vector<56x1xf32>
    %12 = arith.divf %10, %11 : vector<56x1xf32>
    %cst_6 = arith.constant 9.99999974E-6 : f32
    %13 = vector.broadcast %cst_6 : f32 to vector<56x1xf32>
    %14 = arith.addf %12, %13 : vector<56x1xf32>
    %15 = math.rsqrt %14 : vector<56x1xf32>
    %16 = vector.broadcast %15 : vector<56x1xf32> to vector<56x32xf32>
    %17 = arith.mulf %7, %16 : vector<56x32xf32>
    %18 = vector.extract_strided_slice %1 {offsets = [0, 0], sizes = [1, 32], strides = [1, 1]} : vector<8x32xf32> to vector<1x32xf32>
    %19 = vector.extract_strided_slice %1 {offsets = [1, 0], sizes = [1, 32], strides = [1, 1]} : vector<8x32xf32> to vector<1x32xf32>
    %20 = vector.extract_strided_slice %17 {offsets = [0, 0], sizes = [16, 32], strides = [1, 1]} : vector<56x32xf32> to vector<16x32xf32>
    %21 = vector.broadcast %18 : vector<1x32xf32> to vector<16x32xf32>
    %22 = arith.mulf %20, %21 : vector<16x32xf32>
    %23 = vector.broadcast %19 : vector<1x32xf32> to vector<16x32xf32>
    %24 = arith.addf %22, %23 : vector<16x32xf32>
    %c0_7 = arith.constant 0 : index
    %c0_8 = arith.constant 0 : index
    %25 = vector.load %arg2[%c0_7, %c0_8] : memref<56x32xf32, #tpu.memory_space<vmem>>, vector<16x32xf32>
    tpu.vector_store %arg2[%c0_7, %c0_8], %24 {strides = array<i32>} : memref<56x32xf32, #tpu.memory_space<vmem>>, vector<16x32xf32>,
    %26 = vector.extract_strided_slice %1 {offsets = [2, 0], sizes = [1, 32], strides = [1, 1]} : vector<8x32xf32> to vector<1x32xf32>
    %27 = vector.extract_strided_slice %1 {offsets = [3, 0], sizes = [1, 32], strides = [1, 1]} : vector<8x32xf32> to vector<1x32xf32>
    %28 = vector.extract_strided_slice %17 {offsets = [16, 0], sizes = [16, 32], strides = [1, 1]} : vector<56x32xf32> to vector<16x32xf32>
    %29 = vector.broadcast %26 : vector<1x32xf32> to vector<16x32xf32>
    %30 = arith.mulf %28, %29 : vector<16x32xf32>
    %31 = vector.broadcast %27 : vector<1x32xf32> to vector<16x32xf32>
    %32 = arith.addf %30, %31 : vector<16x32xf32>
    %c16 = arith.constant 16 : index
    %c0_9 = arith.constant 0 : index
    %33 = vector.load %arg2[%c16, %c0_9] : memref<56x32xf32, #tpu.memory_space<vmem>>, vector<16x32xf32>
    tpu.vector_store %arg2[%c16, %c0_9], %32 {strides = array<i32>} : memref<56x32xf32, #tpu.memory_space<vmem>>, vector<16x32xf32>,
    %34 = vector.extract_strided_slice %1 {offsets = [4, 0], sizes = [1, 32], strides = [1, 1]} : vector<8x32xf32> to vector<1x32xf32>
    %35 = vector.extract_strided_slice %1 {offsets = [5, 0], sizes = [1, 32], strides = [1, 1]} : vector<8x32xf32> to vector<1x32xf32>
    %36 = vector.extract_strided_slice %17 {offsets = [32, 0], sizes = [16, 32], strides = [1, 1]} : vector<56x32xf32> to vector<16x32xf32>
    %37 = vector.broadcast %34 : vector<1x32xf32> to vector<16x32xf32>
    %38 = arith.mulf %36, %37 : vector<16x32xf32>
    %39 = vector.broadcast %35 : vector<1x32xf32> to vector<16x32xf32>
    %40 = arith.addf %38, %39 : vector<16x32xf32>
    %c32 = arith.constant 32 : index
    %c0_10 = arith.constant 0 : index
    %41 = vector.load %arg2[%c32, %c0_10] : memref<56x32xf32, #tpu.memory_space<vmem>>, vector<16x32xf32>
    tpu.vector_store %arg2[%c32, %c0_10], %40 {strides = array<i32>} : memref<56x32xf32, #tpu.memory_space<vmem>>, vector<16x32xf32>,
    %42 = vector.extract_strided_slice %1 {offsets = [6, 0], sizes = [1, 32], strides = [1, 1]} : vector<8x32xf32> to vector<1x32xf32>
    %43 = vector.extract_strided_slice %1 {offsets = [7, 0], sizes = [1, 32], strides = [1, 1]} : vector<8x32xf32> to vector<1x32xf32>
    %44 = vector.extract_strided_slice %17 {offsets = [48, 0], sizes = [8, 32], strides = [1, 1]} : vector<56x32xf32> to vector<8x32xf32>
    %45 = vector.broadcast %42 : vector<1x32xf32> to vector<8x32xf32>
    %46 = arith.mulf %44, %45 : vector<8x32xf32>
    %47 = vector.broadcast %43 : vector<1x32xf32> to vector<8x32xf32>
    %48 = arith.addf %46, %47 : vector<8x32xf32>
    %c48 = arith.constant 48 : index
    %c0_11 = arith.constant 0 : index
    %49 = vector.load %arg2[%c48, %c0_11] : memref<56x32xf32, #tpu.memory_space<vmem>>, vector<8x32xf32>
    tpu.vector_store %arg2[%c48, %c0_11], %48 {strides = array<i32>} : memref<56x32xf32, #tpu.memory_space<vmem>>, vector<8x32xf32>,
    return
  }
}

</mosaic_0001>

<bundles_post_ra>
// kernel: tpu_custom_call.1
= control target key start
LH: loop header
LB: loop body
LE: loop exit
PB: predicated region body
PF: predicated region fallthrough
CT: control target
= control target key end

     0   :  { %vm19_vm0 = vcmask 261120   ;;  %v112_v51 = vlaneseq  ;;  %s309_s0 = inlined_call_operand.vmem [shape: f32[56,32], index: 0, kind: input, shape index: {}]   ;;  %s310_s1 = inlined_call_operand.vmem [shape: f32[8,32], index: 1, kind: input, shape index: {}]   ;;  %s311_s2 = inlined_call_operand.vmem [shape: f32[56,32], index: 2, kind: output, shape index: {}]  }
   0x1   :  { %v11_v0 = vld [vmem:[%s309_s0] sm:$0xff]  ;;  %v13_v1 = vld [vmem:[%s309_s0 + $0x10] sm:$0xff]  ;;  %v12_v2 = vld [vmem:[%s309_s0 + $0x8] sm:$0xff] }
   0x2   :  { %v20_v3 = vsel %vm19_vm0, %v11_v0, 0.0  ;;  %v26_v4 = vsel %vm19_vm0, %v13_v1, 0.0  ;;  %v14_v5 = vld [vmem:[%s309_s0 + $0x18] sm:$0xff]  ;;  %v23_v6 = vsel %vm19_vm0, %v12_v2, 0.0  ;;  %v15_v8 = vld [vmem:[%s309_s0 + $0x20] sm:$0xff]  ;;  %v16_v9 = vld [vmem:[%s309_s0 + $0x28] sm:$0xff] }
   0x3   :  { %21 = vadd.xlane.f32.xlu0 %v20_v3  ;;  %27 = vadd.xlane.f32.xlu1 %v26_v4  ;;  %v29_v7 = vsel %vm19_vm0, %v14_v5, 0.0  ;;  %v32_v10 = vsel %vm19_vm0, %v15_v8, 0.0  ;;  %v35_v11 = vsel %vm19_vm0, %v16_v9, 0.0  ;;  %v17_v12 = vld [vmem:[%s309_s0 + $0x30] sm:$0xff]  ;;  %v261_v57 = vshrl.u32 %v112_v51, 7 }
   0x4   :  { %v38_v13 = vsel %vm19_vm0, %v17_v12, 0.0 }
   0x5   :  { %v120_v4 = vsub.s32 1, %v261_v57 }
   0x7   :  { %24 = vadd.xlane.f32.xlu0 %v23_v6  ;;  %30 = vadd.xlane.f32.xlu1 %v29_v7 }
   0xb   :  { %33 = vadd.xlane.f32.xlu0 %v32_v10  ;;  %36 = vadd.xlane.f32.xlu1 %v35_v11  ;;  %v128_v10 = vsub.s32 2, %v261_v57 }
   0xf   :  { %39 = vadd.xlane.f32.xlu0 %v38_v13 }
  0x90   :  { %v22_v14 = vpop.xlane.xlu0 %21  ;;  %v28_v15 = vpop.xlane.xlu1 %27 }
  0x91   :  { %v42_v16 = vmul.f32 0.03125, %v22_v14  ;;  %v44_v17 = vmul.f32 0.03125, %v28_v15 }
  0x93   :  { %v226_v18 = vsub.f32 %v11_v0, %v42_v16  ;;  %v228_v19 = vsub.f32 %v13_v1, %v44_v17  ;;  %v114_v0 = vsub.s32 0, %v261_v57  ;;  %v18_v1 = vld [vmem:[%s310_s1] sm:$0xff]  ;;  %v134_v16 = vsub.s32 3, %v261_v57 }
  0x94   :  { %v25_v20 = vpop.xlane.xlu0 %24  ;;  %v31_v21 = vpop.xlane.xlu1 %30  ;;  %v121_v14 = vrot.slane %v18_v1, %v120_v4 }
  0x95   :  { %v43_v22 = vmul.f32 0.03125, %v25_v20  ;;  %v45_v23 = vmul.f32 0.03125, %v31_v21  ;;  %v56_v24 = vmul.f32 %v226_v18, %v226_v18  ;;  %v58_v25 = vmul.f32 %v228_v19, %v228_v19 }
  0x96   :  { %v129_v20 = vrot.slane %v18_v1, %v128_v10  ;;  %v142_v21 = vsub.s32 4, %v261_v57 }
  0x97   :  { %v234_v26 = vsub.f32 %v12_v2, %v43_v22  ;;  %v236_v27 = vsub.f32 %v14_v5, %v45_v23  ;;  %v63_v28 = vsel %vm19_vm0, %v56_v24, 0.0  ;;  %v69_v31 = vsel %vm19_vm0, %v58_v25, 0.0 }
  0x98   :  { %64 = vadd.xlane.f32.xlu1 %v63_v28  ;;  %v34_v29 = vpop.xlane.xlu0 %33  ;;  %v37_v30 = vpop.xlane.xlu1 %36  ;;  %v135_v25 = vrot.slane %v18_v1, %v134_v16 }
  0x99   :  { %v46_v32 = vmul.f32 0.03125, %v34_v29  ;;  %v47_v33 = vmul.f32 0.03125, %v37_v30  ;;  %v57_v34 = vmul.f32 %v234_v26, %v234_v26  ;;  %v59_v35 = vmul.f32 %v236_v27, %v236_v27 }
  0x9a   :  { %v148_v29 = vsub.s32 5, %v261_v57 }
  0x9b   :  { %v244_v36 = vsub.f32 %v15_v8, %v46_v32  ;;  %v246_v37 = vsub.f32 %v16_v9, %v47_v33  ;;  %v66_v38 = vsel %vm19_vm0, %v57_v34, 0.0  ;;  %v72_v41 = vsel %vm19_vm0, %v59_v35, 0.0 }
  0x9c   :  { %70 = vadd.xlane.f32.xlu1 %v69_v31  ;;  %67 = vadd.xlane.f32.xlu0 %v66_v38  ;;  %v40_v39 = vpop.xlane.xlu0 %39  ;;  %v115_v9 = vrot.slane %v18_v1, %v114_v0  ;;  %v143_v31 = vrot.slane %v18_v1, %v142_v21  ;;  %v156_v32 = vsub.s32 6, %v261_v57 }
  0x9d   :  { %v48_v40 = vmul.f32 0.03125, %v40_v39  ;;  %v60_v42 = vmul.f32 %v244_v36, %v244_v36  ;;  %v61_v43 = vmul.f32 %v246_v37, %v246_v37  ;;  %v149_v39 = vrot.slane %v18_v1, %v148_v29 }
  0x9f   :  { %v254_v44 = vsub.f32 %v17_v12, %v48_v40  ;;  %v75_v45 = vsel %vm19_vm0, %v60_v42, 0.0  ;;  %v78_v46 = vsel %vm19_vm0, %v61_v43, 0.0  ;;  %v161_v40 = vsub.s32 7, %v261_v57 }
  0xa0   :  { %73 = vadd.xlane.f32.xlu0 %v72_v41  ;;  %76 = vadd.xlane.f32.xlu1 %v75_v45  ;;  %v157_v43 = vrot.slane %v18_v1, %v156_v32 }
  0xa1   :  { %v62_v47 = vmul.f32 %v254_v44, %v254_v44 }
  0xa3   :  { %v81_v48 = vsel %vm19_vm0, %v62_v47, 0.0 }
  0xa4   :  { %79 = vadd.xlane.f32.xlu0 %v78_v46  ;;  %82 = vadd.xlane.f32.xlu1 %v81_v48  ;;  %v162_v48 = vrot.slane %v18_v1, %v161_v40 }
 0x125   :  { %v65_v49 = vpop.xlane.xlu1 %64 }
 0x126   :  { %v84_v50 = vmul.f32 0.03125, %v65_v49 }
 0x128   :  { %v91_v52 = vadd.f32 1e-05, %v84_v50 }
 0x129   :  { %v71_v53 = vpop.xlane.xlu1 %70  ;;  %v68_v54 = vpop.xlane.xlu0 %67 }
 0x12a   :  { %169 = vrsqrt.f32 %v91_v52  ;;  %v86_v55 = vmul.f32 0.03125, %v71_v53  ;;  %v85_v56 = vmul.f32 0.03125, %v68_v54 }
 0x12c   :  { %v93_v58 = vadd.f32 1e-05, %v86_v55  ;;  %v92_v59 = vadd.f32 1e-05, %v85_v56 }
 0x12d   :  { %v77_v60 = vpop.xlane.xlu1 %76  ;;  %v74_v61 = vpop.xlane.xlu0 %73 }
 0x12e   :  { %171 = vrsqrt.f32 %v93_v58  ;;  %v88_v62 = vmul.f32 0.03125, %v77_v60  ;;  %v87_v63 = vmul.f32 0.03125, %v74_v61 }
 0x12f   :  { %173 = vrsqrt.f32 %v92_v59 }
 0x130   :  { %v95_v2 = vadd.f32 1e-05, %v88_v62  ;;  %v94_v3 = vadd.f32 1e-05, %v87_v63 }
 0x131   :  { %v83_v5 = vpop.xlane.xlu1 %82  ;;  %v80_v6 = vpop.xlane.xlu0 %79 }
 0x132   :  { %175 = vrsqrt.f32 %v95_v2  ;;  %v90_v7 = vmul.f32 0.03125, %v83_v5  ;;  %v89_v8 = vmul.f32 0.03125, %v80_v6 }
 0x133   :  { %177 = vrsqrt.f32 %v94_v3 }
 0x134   :  { %v170_v11 = vpop.eup %169  ;;  %v97_v12 = vadd.f32 1e-05, %v90_v7  ;;  %v96_v13 = vadd.f32 1e-05, %v89_v8 }
 0x135   :  { %v105_v15 = vmul.f32 %v170_v11, %v226_v18 }
 0x136   :  { %179 = vrsqrt.f32 %v97_v12 }
 0x137   :  { %v116_v17 = vmul.f32 %v115_v9, %v105_v15  ;;  %181 = vrsqrt.f32 %v96_v13 }
 0x138   :  { %v172_v22 = vpop.eup %171 }
 0x139   :  { %v174_v23 = vpop.eup %173  ;;  %v122_v24 = vadd.f32 %v121_v14, %v116_v17  ;;  %v107_v28 = vmul.f32 %v172_v22, %v228_v19 }
 0x13a   :  { %v106_v30 = vmul.f32 %v174_v23, %v234_v26 }
 0x13b   :  { %124 = vst.msk [vmem:[%s311_s2] sm:$0xff] %vm19_vm0, %v122_v24  ;;  %v130_v18 = vmul.f32 %v129_v20, %v107_v28 }
 0x13c   :  { %v176_v33 = vpop.eup %175  ;;  %v117_v34 = vmul.f32 %v115_v9, %v106_v30 }
 0x13d   :  { %v178_v35 = vpop.eup %177  ;;  %v136_v38 = vadd.f32 %v135_v25, %v130_v18  ;;  %v109_v19 = vmul.f32 %v176_v33, %v244_v36 }
 0x13e   :  { %v123_v41 = vadd.f32 %v121_v14, %v117_v34  ;;  %v108_v26 = vmul.f32 %v178_v35, %v236_v27 }
 0x13f   :  { %138 = vst.msk [vmem:[%s311_s2 + $0x10] sm:$0xff] %vm19_vm0, %v136_v38  ;;  %v144_v42 = vmul.f32 %v143_v31, %v109_v19 }
 0x140   :  { %v180_v45 = vpop.eup %179  ;;  %125 = vst.msk [vmem:[%s311_s2 + $0x8] sm:$0xff] %vm19_vm0, %v123_v41  ;;  %v131_v46 = vmul.f32 %v129_v20, %v108_v26 }
 0x141   :  { %v182_v36 = vpop.eup %181  ;;  %v150_v47 = vadd.f32 %v149_v39, %v144_v42  ;;  %v111_v49 = vmul.f32 %v180_v45, %v254_v44 }
 0x142   :  { %v137_v27 = vadd.f32 %v135_v25, %v131_v46  ;;  %v110_v50 = vmul.f32 %v182_v36, %v246_v37 }
 0x143   :  { %152 = vst.msk [vmem:[%s311_s2 + $0x20] sm:$0xff] %vm19_vm0, %v150_v47  ;;  %v158_v51 = vmul.f32 %v157_v43, %v111_v49 }
 0x144   :  { %139 = vst.msk [vmem:[%s311_s2 + $0x18] sm:$0xff] %vm19_vm0, %v137_v27  ;;  %v145_v52 = vmul.f32 %v143_v31, %v110_v50 }
 0x145   :  { %v163_v53 = vadd.f32 %v162_v48, %v158_v51 }
 0x146   :  { %v151_v54 = vadd.f32 %v149_v39, %v145_v52 }
 0x147   :  { %164 = vst.msk [vmem:[%s311_s2 + $0x30] sm:$0xff] %vm19_vm0, %v163_v53 }
 0x148   :  { %153 = vst.msk [vmem:[%s311_s2 + $0x28] sm:$0xff] %vm19_vm0, %v151_v54 }

</bundles_post_ra>
